<compile_context>
chip_gen: v7x
topology: tpu7x:2x2x1
jax: 0.10.0
libtpu: 0.0.40
codegen_flags: <defaults>
</compile_context>

<pallas_src>
import jax
import jax.numpy as jnp
from jax.experimental import pallas as pl
from jax.experimental.pallas import tpu as pltpu

# ---- static configuration (stand-ins for conf.CONTEXT_SPACE / conf.WIDTH_SPACE) ----
NUM_CONTEXT_OPTION = 8          # len(conf.CONTEXT_SPACE)
HIDDEN_SIZE = 64                # hidden_size
NUM_STEPS = 4                   # num_steps
INPUT_SIZE = NUM_CONTEXT_OPTION # feedback loop requires input_size == num_context_option
GATE_PAD = 128                  # lanes per gate block (vreg-aligned; >= HIDDEN_SIZE)
OUT_PAD = 128                   # lane-dense output width (>= NUM_CONTEXT_OPTION)

USE_BF16_MXU = True             # bf16 MXU operands / f32 accumulate (fast path on v6e/v7x)
MXU_DTYPE = jnp.bfloat16 if USE_BF16_MXU else jnp.float32


def _sigmoid_via_tanh(x):
    """sigmoid(x) = 0.5*tanh(0.5*x) + 0.5 : one EUP push + cheap VPU ops (no exp+divide)."""
    return 0.5 * jnp.tanh(0.5 * x) + 0.5


def _agent_kernel(x_ref, w_ih_ref, b0_ref, w_rec_ref, b_rec_ref,
                  dec_w_ref, dec_b_ref, out_ref):
    """Single-block kernel: full NUM_STEPS fused-recurrence rollout + deferred decoder.

    Shapes (GP = GATE_PAD = 128, OP = OUT_PAD = 128):
      x_ref:     (1, I)           w_ih_ref:  (I, 4*GP)   [MXU_DTYPE]
      b0_ref:    (1, 4*GP) f32    w_rec_ref: (GP, 4*GP)  [MXU_DTYPE]
      b_rec_ref: (1, 4*GP) f32    dec_w_ref: (GP, OP)    [MXU_DTYPE]
      dec_b_ref: (1, OP)   f32    out_ref:   (NUM_STEPS, OP) f32
    """
    GP = GATE_PAD

    # Module always starts from zero hidden state; padded lanes of h/c stay exactly 0.
    c = jnp.zeros((1, GP), jnp.float32)

    # Step 0 pre-activation: h0 == 0, so only the x0 term survives.
    z = jnp.dot(x_ref[...].astype(MXU_DTYPE), w_ih_ref[...],
                preferred_element_type=jnp.float32) + b0_ref[...]          # (1, 4*GP)

    hs = []
    # NUM_STEPS is small and static -> unrolled Python loop.
    for t in range(NUM_STEPS):
        # Vreg-aligned gate slices (each gate owns a full 128-lane block).
        i_g = _sigmoid_via_tanh(z[:, 0 * GP:1 * GP])
        f_g = _sigmoid_via_tanh(z[:, 1 * GP:2 * GP])
        g_g = jnp.tanh(z[:, 2 * GP:3 * GP])
        o_g = _sigmoid_via_tanh(z[:, 3 * GP:4 * GP])
        c = f_g * c + i_g * g_g
        h = o_g * jnp.tanh(c)
        hs.append(h)

        if t + 1 < NUM_STEPS:
            # Fused feedback: z_{t+1} = h_t @ W_rec + b_rec (decoder folded into recurrence).
            # Weight loaded per-use from VMEM (no long vreg live range across the unroll).
            z = jnp.dot(h.astype(MXU_DTYPE), w_rec_ref[...],
                        preferred_element_type=jnp.float32) + b_rec_ref[...]

    # Decoder deferred off the serial chain: one batched (NUM_STEPS, GP) @ (GP, OP) matmul
    # with M=NUM_STEPS sublanes, then a single lane-dense store.
    h_all = jnp.concatenate(hs, axis=0)                                    # (NUM_STEPS, GP)
    out = jnp.dot(h_all.astype(MXU_DTYPE), dec_w_ref[...],
                  preferred_element_type=jnp.float32) + dec_b_ref[...]     # (NUM_STEPS, OP)
    out_ref[...] = out


def prepare_agent_params(w_ih, w_hh, b_ih, b_hh, dec_w, dec_b):
    """One-time parameter preparation (hoisted out of the per-call path).

    PyTorch layouts in:
      w_ih: (4H, I), w_hh: (4H, H), b_ih/b_hh: (4H,), dec_w: (O, H), dec_b: (O,)
    """
    H, O, GP, OP = HIDDEN_SIZE, NUM_CONTEXT_OPTION, GATE_PAD, OUT_PAD

    w_ih_t = jnp.asarray(w_ih, jnp.float32).T      # (I, 4H)
    w_hh_t = jnp.asarray(w_hh, jnp.float32).T      # (H, 4H)
    dec_w_t = jnp.asarray(dec_w, jnp.float32).T    # (H, O)
    dec_b_f = jnp.asarray(dec_b, jnp.float32)      # (O,)
    b_lstm = jnp.asarray(b_ih, jnp.float32) + jnp.asarray(b_hh, jnp.float32)  # (4H,)

    # Algebraic fusion of the decoder feedback into the recurrence (exact in real arithmetic):
    #   x_{t+1} = h_t @ dec_w_t + dec_b  =>  z_{t+1} = h_t @ W_rec + b_rec
    w_rec = dec_w_t @ w_ih_t + w_hh_t              # (H, 4H)
    b_rec = dec_b_f @ w_ih_t + b_lstm              # (4H,)

    def pad_gate_cols(m):
        """(rows, 4H) -> (rows, 4*GP): gate g occupies cols [g*GP, g*GP+H), rest exactly 0."""
        rows = m.shape[0]
        out = jnp.zeros((rows, 4 * GP), jnp.float32)
        for g in range(4):
            out = out.at[:, g * GP:g * GP + H].set(m[:, g * H:(g + 1) * H])
        return out

    def pad_rows(m):
        """(H, cols) -> (GP, cols) with zero rows H..GP (padded h-lanes contribute 0)."""
        return jnp.zeros((GP,) + m.shape[1:], jnp.float32).at[:H].set(m)

    def pad_out_cols(m):
        """(rows, O) -> (rows, OP) with zero cols O..OP (lane-dense output)."""
        return jnp.zeros(m.shape[:-1] + (OP,), jnp.float32).at[..., :O].set(m)

    # Weights go to the MXU dtype (bf16 fast path on v6e/v7x); biases stay f32 (VPU adds).
    w_ih_p = pad_gate_cols(w_ih_t).astype(MXU_DTYPE)              # (I, 4*GP)
    b0_p = pad_gate_cols(b_lstm[None, :])                         # (1, 4*GP) f32
    w_rec_p = pad_rows(pad_gate_cols(w_rec)).astype(MXU_DTYPE)    # (GP, 4*GP)
    b_rec_p = pad_gate_cols(b_rec[None, :])                       # (1, 4*GP) f32
    dec_w_p = pad_out_cols(pad_rows(dec_w_t)).astype(MXU_DTYPE)   # (GP, OP)
    dec_b_p = pad_out_cols(dec_b_f[None, :])                      # (1, OP) f32
    return (w_ih_p, b0_p, w_rec_p, b_rec_p, dec_w_p, dec_b_p)


def _cost_estimate():
    GP, OP, I, S = GATE_PAD, OUT_PAD, INPUT_SIZE, NUM_STEPS
    flops = 2 * (1 * I * 4 * GP + (S - 1) * 1 * GP * 4 * GP + S * GP * OP)
    transcendentals = S * 5 * GP                      # 4 gate EUP pushes + tanh(c) per step
    bytes_accessed = (
        4 * (1 * I) +                                  # x0 (f32)
        jnp.dtype(MXU_DTYPE).itemsize * (I * 4 * GP + GP * 4 * GP + GP * OP) +
        4 * (2 * 4 * GP + OP) +                        # biases (f32)
        4 * (S * OP))                                  # output
    return pl.CostEstimate(flops=flops, transcendentals=transcendentals,
                           bytes_accessed=int(bytes_accessed))


@jax.jit
def agent_forward(x0, w_ih_p, b0_p, w_rec_p, b_rec_p, dec_w_p, dec_b_p):
    """Per-call path: only the Pallas kernel (no parameter re-layout per call).

    Returns (NUM_STEPS, NUM_CONTEXT_OPTION) float32, matching Agent.forward.
    """
    vmem = pl.BlockSpec(memory_space=pltpu.MemorySpace.VMEM)
    out_padded = pl.pallas_call(
        _agent_kernel,
        out_shape=jax.ShapeDtypeStruct((NUM_STEPS, OUT_PAD), jnp.float32),
        in_specs=[vmem] * 7,
        out_specs=vmem,
        cost_estimate=_cost_estimate(),
    )(x0.astype(jnp.float32), w_ih_p, b0_p, w_rec_p, b_rec_p, dec_w_p, dec_b_p)
    return out_padded[:, :NUM_CONTEXT_OPTION]


def _reference_forward(x0, w_ih, w_hh, b_ih, b_hh, dec_w, dec_b):
    """Pure-JAX f32 reference (mirrors torch.nn.LSTMCell + Linear, zero initial hidden)."""
    H = HIDDEN_SIZE
    x = x0
    h = jnp.zeros((1, H), jnp.float32)
    c = jnp.zeros((1, H), jnp.float32)
    outs = []
    for _ in range(NUM_STEPS):
        z = x @ w_ih.T + b_ih + h @ w_hh.T + b_hh
        i_g = jax.nn.sigmoid(z[:, 0 * H:1 * H])
        f_g = jax.nn.sigmoid(z[:, 1 * H:2 * H])
        g_g = jnp.tanh(z[:, 2 * H:3 * H])
        o_g = jax.nn.sigmoid(z[:, 3 * H:4 * H])
        c = f_g * c + i_g * g_g
        h = o_g * jnp.tanh(c)
        out = h @ dec_w.T + dec_b
        outs.append(out)
        x = out
    return jnp.concatenate(outs, axis=0)  # stack + squeeze(1) with batch=1


if __name__ == "__main__":
    key = jax.random.PRNGKey(0)
    ks = jax.random.split(key, 7)

    H, I, O, GP = HIDDEN_SIZE, INPUT_SIZE, NUM_CONTEXT_OPTION, GATE_PAD
    bound = 1.0 / jnp.sqrt(H)

    # Deterministic synthetic parameters (PyTorch LSTMCell / Linear shapes).
    w_ih = jax.random.uniform(ks[0], (4 * H, I), jnp.float32, -bound, bound)
    w_hh = jax.random.uniform(ks[1], (4 * H, H), jnp.float32, -bound, bound)
    b_ih = jax.random.uniform(ks[2], (4 * H,), jnp.float32, -bound, bound)
    b_hh = jax.random.uniform(ks[3], (4 * H,), jnp.float32, -bound, bound)
    dec_w = jax.random.uniform(ks[4], (O, H), jnp.float32, -bound, bound)
    dec_b = jax.random.uniform(ks[5], (O,), jnp.float32, -bound, bound)

    # Module input (batch=1, matching self.hidden init).
    x0 = jax.random.normal(ks[6], (1, I), jnp.float32)

    # One-time parameter prep (cached layout/fusion/dtype), then the kernel call.
    params = prepare_agent_params(w_ih, w_hh, b_ih, b_hh, dec_w, dec_b)
    params = jax.block_until_ready(params)
    w_ih_p, b0_p, w_rec_p, b_rec_p, dec_w_p, dec_b_p = params

    # Pad-region invariants (padded h/c lanes must stay exactly 0 inside the kernel).
    for g in range(4):
        assert not bool(jnp.any(w_ih_p[:, g * GP + H:(g + 1) * GP]))
        assert not bool(jnp.any(w_rec_p[:, g * GP + H:(g + 1) * GP]))
        assert not bool(jnp.any(b0_p[:, g * GP + H:(g + 1) * GP]))
        assert not bool(jnp.any(b_rec_p[:, g * GP + H:(g + 1) * GP]))
    assert not bool(jnp.any(w_rec_p[H:, :]))
    assert not bool(jnp.any(dec_w_p[H:, :]))
    assert not bool(jnp.any(dec_w_p[:, O:]))
    assert not bool(jnp.any(dec_b_p[:, O:]))

    out = agent_forward(x0, *params)
    out = jax.block_until_ready(out)

    ref = _reference_forward(x0, w_ih, w_hh, b_ih, b_hh, dec_w, dec_b)
    assert out.shape == (NUM_STEPS, NUM_CONTEXT_OPTION), out.shape
    # f32 path: ~1e-4 (W_rec fusion changes f32 summation order).
    # bf16 MXU-operand path: ~1e-2 (operand rounding, smoothed by sigmoid/tanh).
    tol = 2e-2 if USE_BF16_MXU else 1e-4
    assert jnp.allclose(out, ref, atol=tol, rtol=tol), (out, ref)

    print("KERNEL_OK")
</pallas_src>

<mosaic_0001>
module attributes {stable_mosaic.version = 11 : i64} {
  func.func @_agent_kernel(%arg0: memref<1x8xf32, #tpu.memory_space<vmem>>, %arg1: memref<8x512xbf16, #tpu.memory_space<vmem>>, %arg2: memref<1x512xf32, #tpu.memory_space<vmem>>, %arg3: memref<128x512xbf16, #tpu.memory_space<vmem>>, %arg4: memref<1x512xf32, #tpu.memory_space<vmem>>, %arg5: memref<128x128xbf16, #tpu.memory_space<vmem>>, %arg6: memref<1x128xf32, #tpu.memory_space<vmem>>, %arg7: memref<4x128xf32, #tpu.memory_space<vmem>>) attributes {dimension_semantics = [], scalar_prefetch = 0 : i64, scratch_operands = 0 : i64, tpu.core_type = #tpu.core_type<tc>} {
    %cst = arith.constant 0.000000e+00 : f32
    %0 = vector.broadcast %cst : f32 to vector<1x128xf32>
    %c0 = arith.constant 0 : index
    %c0_0 = arith.constant 0 : index
    %1 = vector.load %arg0[%c0, %c0_0] : memref<1x8xf32, #tpu.memory_space<vmem>>, vector<1x8xf32>
    %2 = arith.truncf %1 : vector<1x8xf32> to vector<1x8xbf16>
    %c0_1 = arith.constant 0 : index
    %c0_2 = arith.constant 0 : index
    %3 = vector.load %arg1[%c0_1, %c0_2] : memref<8x512xbf16, #tpu.memory_space<vmem>>, vector<8x512xbf16>
    %cst_3 = arith.constant dense<0.000000e+00> : vector<1x512xf32>
    %4 = tpu.matmul %2, %3, %cst_3 {dimension_numbers = #tpu.dot_dimension_numbers<[1], [0], [0], [1], [0, 0, 1, 1], [], []>} : vector<1x8xbf16>, vector<8x512xbf16>, vector<1x512xf32> -> vector<1x512xf32>
    %c0_4 = arith.constant 0 : index
    %c0_5 = arith.constant 0 : index
    %5 = vector.load %arg2[%c0_4, %c0_5] : memref<1x512xf32, #tpu.memory_space<vmem>>, vector<1x512xf32>
    %6 = arith.addf %4, %5 : vector<1x512xf32>
    %7 = vector.extract_strided_slice %6 {offsets = [0, 0], sizes = [1, 128], strides = [1, 1]} : vector<1x512xf32> to vector<1x128xf32>
    %cst_6 = arith.constant 5.000000e-01 : f32
    %8 = vector.broadcast %cst_6 : f32 to vector<1x128xf32>
    %9 = arith.mulf %8, %7 : vector<1x128xf32>
    %10 = math.tanh %9 : vector<1x128xf32>
    %cst_7 = arith.constant 5.000000e-01 : f32
    %11 = vector.broadcast %cst_7 : f32 to vector<1x128xf32>
    %12 = arith.mulf %11, %10 : vector<1x128xf32>
    %cst_8 = arith.constant 5.000000e-01 : f32
    %13 = vector.broadcast %cst_8 : f32 to vector<1x128xf32>
    %14 = arith.addf %12, %13 : vector<1x128xf32>
    %15 = vector.extract_strided_slice %6 {offsets = [0, 128], sizes = [1, 128], strides = [1, 1]} : vector<1x512xf32> to vector<1x128xf32>
    %cst_9 = arith.constant 5.000000e-01 : f32
    %16 = vector.broadcast %cst_9 : f32 to vector<1x128xf32>
    %17 = arith.mulf %16, %15 : vector<1x128xf32>
    %18 = math.tanh %17 : vector<1x128xf32>
    %cst_10 = arith.constant 5.000000e-01 : f32
    %19 = vector.broadcast %cst_10 : f32 to vector<1x128xf32>
    %20 = arith.mulf %19, %18 : vector<1x128xf32>
    %cst_11 = arith.constant 5.000000e-01 : f32
    %21 = vector.broadcast %cst_11 : f32 to vector<1x128xf32>
    %22 = arith.addf %20, %21 : vector<1x128xf32>
    %23 = vector.extract_strided_slice %6 {offsets = [0, 256], sizes = [1, 128], strides = [1, 1]} : vector<1x512xf32> to vector<1x128xf32>
    %24 = math.tanh %23 : vector<1x128xf32>
    %25 = vector.extract_strided_slice %6 {offsets = [0, 384], sizes = [1, 128], strides = [1, 1]} : vector<1x512xf32> to vector<1x128xf32>
    %cst_12 = arith.constant 5.000000e-01 : f32
    %26 = vector.broadcast %cst_12 : f32 to vector<1x128xf32>
    %27 = arith.mulf %26, %25 : vector<1x128xf32>
    %28 = math.tanh %27 : vector<1x128xf32>
    %cst_13 = arith.constant 5.000000e-01 : f32
    %29 = vector.broadcast %cst_13 : f32 to vector<1x128xf32>
    %30 = arith.mulf %29, %28 : vector<1x128xf32>
    %cst_14 = arith.constant 5.000000e-01 : f32
    %31 = vector.broadcast %cst_14 : f32 to vector<1x128xf32>
    %32 = arith.addf %30, %31 : vector<1x128xf32>
    %33 = arith.mulf %22, %0 : vector<1x128xf32>
    %34 = arith.mulf %14, %24 : vector<1x128xf32>
    %35 = arith.addf %33, %34 : vector<1x128xf32>
    %36 = math.tanh %35 : vector<1x128xf32>
    %37 = arith.mulf %32, %36 : vector<1x128xf32>
    %38 = arith.truncf %37 : vector<1x128xf32> to vector<1x128xbf16>
    %c0_15 = arith.constant 0 : index
    %c0_16 = arith.constant 0 : index
    %39 = vector.load %arg3[%c0_15, %c0_16] : memref<128x512xbf16, #tpu.memory_space<vmem>>, vector<128x512xbf16>
    %cst_17 = arith.constant dense<0.000000e+00> : vector<1x512xf32>
    %40 = tpu.matmul %38, %39, %cst_17 {dimension_numbers = #tpu.dot_dimension_numbers<[1], [0], [0], [1], [0, 0, 1, 1], [], []>} : vector<1x128xbf16>, vector<128x512xbf16>, vector<1x512xf32> -> vector<1x512xf32>
    %c0_18 = arith.constant 0 : index
    %c0_19 = arith.constant 0 : index
    %41 = vector.load %arg4[%c0_18, %c0_19] : memref<1x512xf32, #tpu.memory_space<vmem>>, vector<1x512xf32>
    %42 = arith.addf %40, %41 : vector<1x512xf32>
    %43 = vector.extract_strided_slice %42 {offsets = [0, 0], sizes = [1, 128], strides = [1, 1]} : vector<1x512xf32> to vector<1x128xf32>
    %cst_20 = arith.constant 5.000000e-01 : f32
    %44 = vector.broadcast %cst_20 : f32 to vector<1x128xf32>
    %45 = arith.mulf %44, %43 : vector<1x128xf32>
    %46 = math.tanh %45 : vector<1x128xf32>
    %cst_21 = arith.constant 5.000000e-01 : f32
    %47 = vector.broadcast %cst_21 : f32 to vector<1x128xf32>
    %48 = arith.mulf %47, %46 : vector<1x128xf32>
    %cst_22 = arith.constant 5.000000e-01 : f32
    %49 = vector.broadcast %cst_22 : f32 to vector<1x128xf32>
    %50 = arith.addf %48, %49 : vector<1x128xf32>
    %51 = vector.extract_strided_slice %42 {offsets = [0, 128], sizes = [1, 128], strides = [1, 1]} : vector<1x512xf32> to vector<1x128xf32>
    %cst_23 = arith.constant 5.000000e-01 : f32
    %52 = vector.broadcast %cst_23 : f32 to vector<1x128xf32>
    %53 = arith.mulf %52, %51 : vector<1x128xf32>
    %54 = math.tanh %53 : vector<1x128xf32>
    %cst_24 = arith.constant 5.000000e-01 : f32
    %55 = vector.broadcast %cst_24 : f32 to vector<1x128xf32>
    %56 = arith.mulf %55, %54 : vector<1x128xf32>
    %cst_25 = arith.constant 5.000000e-01 : f32
    %57 = vector.broadcast %cst_25 : f32 to vector<1x128xf32>
    %58 = arith.addf %56, %57 : vector<1x128xf32>
    %59 = vector.extract_strided_slice %42 {offsets = [0, 256], sizes = [1, 128], strides = [1, 1]} : vector<1x512xf32> to vector<1x128xf32>
    %60 = math.tanh %59 : vector<1x128xf32>
    %61 = vector.extract_strided_slice %42 {offsets = [0, 384], sizes = [1, 128], strides = [1, 1]} : vector<1x512xf32> to vector<1x128xf32>
    %cst_26 = arith.constant 5.000000e-01 : f32
    %62 = vector.broadcast %cst_26 : f32 to vector<1x128xf32>
    %63 = arith.mulf %62, %61 : vector<1x128xf32>
    %64 = math.tanh %63 : vector<1x128xf32>
    %cst_27 = arith.constant 5.000000e-01 : f32
    %65 = vector.broadcast %cst_27 : f32 to vector<1x128xf32>
    %66 = arith.mulf %65, %64 : vector<1x128xf32>
    %cst_28 = arith.constant 5.000000e-01 : f32
    %67 = vector.broadcast %cst_28 : f32 to vector<1x128xf32>
    %68 = arith.addf %66, %67 : vector<1x128xf32>
    %69 = arith.mulf %58, %35 : vector<1x128xf32>
    %70 = arith.mulf %50, %60 : vector<1x128xf32>
    %71 = arith.addf %69, %70 : vector<1x128xf32>
    %72 = math.tanh %71 : vector<1x128xf32>
    %73 = arith.mulf %68, %72 : vector<1x128xf32>
    %74 = arith.truncf %73 : vector<1x128xf32> to vector<1x128xbf16>
    %c0_29 = arith.constant 0 : index
    %c0_30 = arith.constant 0 : index
    %75 = vector.load %arg3[%c0_29, %c0_30] : memref<128x512xbf16, #tpu.memory_space<vmem>>, vector<128x512xbf16>
    %cst_31 = arith.constant dense<0.000000e+00> : vector<1x512xf32>
    %76 = tpu.matmul %74, %75, %cst_31 {dimension_numbers = #tpu.dot_dimension_numbers<[1], [0], [0], [1], [0, 0, 1, 1], [], []>} : vector<1x128xbf16>, vector<128x512xbf16>, vector<1x512xf32> -> vector<1x512xf32>
    %c0_32 = arith.constant 0 : index
    %c0_33 = arith.constant 0 : index
    %77 = vector.load %arg4[%c0_32, %c0_33] : memref<1x512xf32, #tpu.memory_space<vmem>>, vector<1x512xf32>
    %78 = arith.addf %76, %77 : vector<1x512xf32>
    %79 = vector.extract_strided_slice %78 {offsets = [0, 0], sizes = [1, 128], strides = [1, 1]} : vector<1x512xf32> to vector<1x128xf32>
    %cst_34 = arith.constant 5.000000e-01 : f32
    %80 = vector.broadcast %cst_34 : f32 to vector<1x128xf32>
    %81 = arith.mulf %80, %79 : vector<1x128xf32>
    %82 = math.tanh %81 : vector<1x128xf32>
    %cst_35 = arith.constant 5.000000e-01 : f32
    %83 = vector.broadcast %cst_35 : f32 to vector<1x128xf32>
    %84 = arith.mulf %83, %82 : vector<1x128xf32>
    %cst_36 = arith.constant 5.000000e-01 : f32
    %85 = vector.broadcast %cst_36 : f32 to vector<1x128xf32>
    %86 = arith.addf %84, %85 : vector<1x128xf32>
    %87 = vector.extract_strided_slice %78 {offsets = [0, 128], sizes = [1, 128], strides = [1, 1]} : vector<1x512xf32> to vector<1x128xf32>
    %cst_37 = arith.constant 5.000000e-01 : f32
    %88 = vector.broadcast %cst_37 : f32 to vector<1x128xf32>
    %89 = arith.mulf %88, %87 : vector<1x128xf32>
    %90 = math.tanh %89 : vector<1x128xf32>
    %cst_38 = arith.constant 5.000000e-01 : f32
    %91 = vector.broadcast %cst_38 : f32 to vector<1x128xf32>
    %92 = arith.mulf %91, %90 : vector<1x128xf32>
    %cst_39 = arith.constant 5.000000e-01 : f32
    %93 = vector.broadcast %cst_39 : f32 to vector<1x128xf32>
    %94 = arith.addf %92, %93 : vector<1x128xf32>
    %95 = vector.extract_strided_slice %78 {offsets = [0, 256], sizes = [1, 128], strides = [1, 1]} : vector<1x512xf32> to vector<1x128xf32>
    %96 = math.tanh %95 : vector<1x128xf32>
    %97 = vector.extract_strided_slice %78 {offsets = [0, 384], sizes = [1, 128], strides = [1, 1]} : vector<1x512xf32> to vector<1x128xf32>
    %cst_40 = arith.constant 5.000000e-01 : f32
    %98 = vector.broadcast %cst_40 : f32 to vector<1x128xf32>
    %99 = arith.mulf %98, %97 : vector<1x128xf32>
    %100 = math.tanh %99 : vector<1x128xf32>
    %cst_41 = arith.constant 5.000000e-01 : f32
    %101 = vector.broadcast %cst_41 : f32 to vector<1x128xf32>
    %102 = arith.mulf %101, %100 : vector<1x128xf32>
    %cst_42 = arith.constant 5.000000e-01 : f32
    %103 = vector.broadcast %cst_42 : f32 to vector<1x128xf32>
    %104 = arith.addf %102, %103 : vector<1x128xf32>
    %105 = arith.mulf %94, %71 : vector<1x128xf32>
    %106 = arith.mulf %86, %96 : vector<1x128xf32>
    %107 = arith.addf %105, %106 : vector<1x128xf32>
    %108 = math.tanh %107 : vector<1x128xf32>
    %109 = arith.mulf %104, %108 : vector<1x128xf32>
    %110 = arith.truncf %109 : vector<1x128xf32> to vector<1x128xbf16>
    %c0_43 = arith.constant 0 : index
    %c0_44 = arith.constant 0 : index
    %111 = vector.load %arg3[%c0_43, %c0_44] : memref<128x512xbf16, #tpu.memory_space<vmem>>, vector<128x512xbf16>
    %cst_45 = arith.constant dense<0.000000e+00> : vector<1x512xf32>
    %112 = tpu.matmul %110, %111, %cst_45 {dimension_numbers = #tpu.dot_dimension_numbers<[1], [0], [0], [1], [0, 0, 1, 1], [], []>} : vector<1x128xbf16>, vector<128x512xbf16>, vector<1x512xf32> -> vector<1x512xf32>
    %c0_46 = arith.constant 0 : index
    %c0_47 = arith.constant 0 : index
    %113 = vector.load %arg4[%c0_46, %c0_47] : memref<1x512xf32, #tpu.memory_space<vmem>>, vector<1x512xf32>
    %114 = arith.addf %112, %113 : vector<1x512xf32>
    %115 = vector.extract_strided_slice %114 {offsets = [0, 0], sizes = [1, 128], strides = [1, 1]} : vector<1x512xf32> to vector<1x128xf32>
    %cst_48 = arith.constant 5.000000e-01 : f32
    %116 = vector.broadcast %cst_48 : f32 to vector<1x128xf32>
    %117 = arith.mulf %116, %115 : vector<1x128xf32>
    %118 = math.tanh %117 : vector<1x128xf32>
    %cst_49 = arith.constant 5.000000e-01 : f32
    %119 = vector.broadcast %cst_49 : f32 to vector<1x128xf32>
    %120 = arith.mulf %119, %118 : vector<1x128xf32>
    %cst_50 = arith.constant 5.000000e-01 : f32
    %121 = vector.broadcast %cst_50 : f32 to vector<1x128xf32>
    %122 = arith.addf %120, %121 : vector<1x128xf32>
    %123 = vector.extract_strided_slice %114 {offsets = [0, 128], sizes = [1, 128], strides = [1, 1]} : vector<1x512xf32> to vector<1x128xf32>
    %cst_51 = arith.constant 5.000000e-01 : f32
    %124 = vector.broadcast %cst_51 : f32 to vector<1x128xf32>
    %125 = arith.mulf %124, %123 : vector<1x128xf32>
    %126 = math.tanh %125 : vector<1x128xf32>
    %cst_52 = arith.constant 5.000000e-01 : f32
    %127 = vector.broadcast %cst_52 : f32 to vector<1x128xf32>
    %128 = arith.mulf %127, %126 : vector<1x128xf32>
    %cst_53 = arith.constant 5.000000e-01 : f32
    %129 = vector.broadcast %cst_53 : f32 to vector<1x128xf32>
    %130 = arith.addf %128, %129 : vector<1x128xf32>
    %131 = vector.extract_strided_slice %114 {offsets = [0, 256], sizes = [1, 128], strides = [1, 1]} : vector<1x512xf32> to vector<1x128xf32>
    %132 = math.tanh %131 : vector<1x128xf32>
    %133 = vector.extract_strided_slice %114 {offsets = [0, 384], sizes = [1, 128], strides = [1, 1]} : vector<1x512xf32> to vector<1x128xf32>
    %cst_54 = arith.constant 5.000000e-01 : f32
    %134 = vector.broadcast %cst_54 : f32 to vector<1x128xf32>
    %135 = arith.mulf %134, %133 : vector<1x128xf32>
    %136 = math.tanh %135 : vector<1x128xf32>
    %cst_55 = arith.constant 5.000000e-01 : f32
    %137 = vector.broadcast %cst_55 : f32 to vector<1x128xf32>
    %138 = arith.mulf %137, %136 : vector<1x128xf32>
    %cst_56 = arith.constant 5.000000e-01 : f32
    %139 = vector.broadcast %cst_56 : f32 to vector<1x128xf32>
    %140 = arith.addf %138, %139 : vector<1x128xf32>
    %141 = arith.mulf %130, %107 : vector<1x128xf32>
    %142 = arith.mulf %122, %132 : vector<1x128xf32>
    %143 = arith.addf %141, %142 : vector<1x128xf32>
    %144 = math.tanh %143 : vector<1x128xf32>
    %145 = arith.mulf %140, %144 : vector<1x128xf32>
    %146 = tpu.concatenate %37, %73, %109, %145 in 0 : vector<1x128xf32>, vector<1x128xf32>, vector<1x128xf32>, vector<1x128xf32> -> vector<4x128xf32>
    %147 = arith.truncf %146 : vector<4x128xf32> to vector<4x128xbf16>
    %c0_57 = arith.constant 0 : index
    %c0_58 = arith.constant 0 : index
    %148 = vector.load %arg5[%c0_57, %c0_58] : memref<128x128xbf16, #tpu.memory_space<vmem>>, vector<128x128xbf16>
    %cst_59 = arith.constant dense<0.000000e+00> : vector<4x128xf32>
    %149 = tpu.matmul %147, %148, %cst_59 {dimension_numbers = #tpu.dot_dimension_numbers<[1], [0], [0], [1], [0, 0, 1, 1], [], []>} : vector<4x128xbf16>, vector<128x128xbf16>, vector<4x128xf32> -> vector<4x128xf32>
    %c0_60 = arith.constant 0 : index
    %c0_61 = arith.constant 0 : index
    %150 = vector.load %arg6[%c0_60, %c0_61] : memref<1x128xf32, #tpu.memory_space<vmem>>, vector<1x128xf32>
    %151 = vector.broadcast %150 : vector<1x128xf32> to vector<4x128xf32>
    %152 = arith.addf %149, %151 : vector<4x128xf32>
    %c0_62 = arith.constant 0 : index
    %c0_63 = arith.constant 0 : index
    %153 = vector.load %arg7[%c0_62, %c0_63] : memref<4x128xf32, #tpu.memory_space<vmem>>, vector<4x128xf32>
    tpu.vector_store %arg7[%c0_62, %c0_63], %152 {strides = array<i32>} : memref<4x128xf32, #tpu.memory_space<vmem>>, vector<4x128xf32>,
    return
  }
}

</mosaic_0001>

<bundles_post_ra>
// kernel: agent_forward.1
= control target key start
LH: loop header
LB: loop body
LE: loop exit
PB: predicated region body
PF: predicated region fallthrough
CT: control target
= control target key end

     0   :  { %12 = vsyncpa [#allocation3], 0  ;;  %s1558_s0 = inlined_call_operand.hbm [shape: f32[1,8], index: 0, kind: input, shape index: {}]   ;;  %s1559_s1 = inlined_call_operand.hbm [shape: bf16[8,512], index: 1, kind: input, shape index: {}]   ;;  %s1560_s2 = inlined_call_operand.vmem [shape: f32[1,512], index: 2, kind: input, shape index: {}]   ;;  %s1561_s3 = inlined_call_operand.hbm [shape: bf16[128,512], index: 3, kind: input, shape index: {}]   ;;  %s1562_s4 = inlined_call_operand.vmem [shape: f32[1,512], index: 4, kind: input, shape index: {}]   ;;  %s1563_s5 = inlined_call_operand.hbm [shape: bf16[128,128], index: 5, kind: input, shape index: {}]   ;;  %s1564_s6 = inlined_call_operand.vmem [shape: f32[1,128], index: 6, kind: input, shape index: {}]   ;;  %s1565_s7 = inlined_call_operand.hbm [shape: f32[4,128], index: 7, kind: output, shape index: {}]  }
   0x1   :  { %13 = vsyncpa [#allocation6], 0 }
   0x2   :  { %14 = vsyncpa [#allocation9], 0 }
   0x3   :  { %15 = vsyncpa [#allocation4], 0  ;;  %s1202_s24 = smov [#allocation5]   ;;  %s1203_s26 = smov [#allocation2]  }
   0x4   :  { %s32_s25 = sshll.u32 %s1202_s24, 4  ;;  %s22_s27 = sshll.u32 %s1203_s26, 4  ;;  %s33_s25 = int_to_ptr.vmem [resolvable:$true] %s32_s25  ;;  %s23_s27 = int_to_ptr.vmem [resolvable:$true] %s22_s27 }
   0x5   :  { %s1084_s30 = scalar_lea.hbm %s1559_s1, 256 }
   0x6   :  { %p1085_p0 = scmp.ne.s32.totalorder %s1559_s1, %s1084_s30  ;;  %p1088_p1 = scmp.lt.u32.totalorder %s1084_s30, %s1559_s1 }
   0x8   :  { %p1090_p2 = pnand %p1088_p1, %p1085_p0 }
   0xa   :  { %1093 = shalt.err (!%p1090_p2)
}
   0xb   :  { %s1094_s12 = scalar_lea.vmem %s33_s25, 256  ;;  %p1099_p4 = scmp.lt.s32.totalorder %s33_s25, %s33_s25 }
   0xc   :  { %p1095_p3 = scmp.ne.s32.totalorder %s33_s25, %s1094_s12  ;;  %p1100_p5 = scmp.lt.s32.totalorder %s1094_s12, %s1094_s12 }
   0xe   :  { %p1101_p6 = por %p1100_p5, %p1099_p4 }
  0x10   :  { %p1102_p7 = pnand %p1101_p6, %p1095_p3 }
  0x12   :  { %1105 = shalt.err (!%p1102_p7)
}
  0x13   :  { %35 = dma.hbm_to_vmem [thread:$0]  %s1559_s1, 256, %s33_s25, [#allocation6]  }
  0x14   :  { %s1106_s17 = scalar_lea.hbm %s1558_s0, 16 }
  0x15   :  { %p1107_p8 = scmp.ne.s32.totalorder %s1558_s0, %s1106_s17  ;;  %p1110_p9 = scmp.lt.u32.totalorder %s1106_s17, %s1558_s0 }
  0x17   :  { %p1112_p10 = pnand %p1110_p9, %p1107_p8 }
  0x19   :  { %1115 = shalt.err (!%p1112_p10)
}
  0x1a   :  { %s1116_s22 = scalar_lea.vmem %s23_s27, 16  ;;  %s1120_s23 = scalar_lea.vmem %s23_s27, 32 }
  0x1b   :  { %p1117_p11 = scmp.ne.s32.totalorder %s23_s27, %s1116_s22  ;;  %p1121_p12 = scmp.lt.s32.totalorder %s23_s27, %s23_s27 }
  0x1c   :  { %p1122_p13 = scmp.lt.s32.totalorder %s1120_s23, %s1116_s22 }
  0x1e   :  { %p1123_p0 = por %p1122_p13, %p1121_p12 }
  0x20   :  { %p1124_p1 = pnand %p1123_p0, %p1117_p11 }
  0x22   :  { %1127 = shalt.err (!%p1124_p1)
}
  0x23   :  { %25 = dma.hbm_to_vmem [thread:$0]  %s1558_s0, 16, %s23_s27, [#allocation3]  }
  0x24   :  { %s1204_s25 = smov [#allocation7]   ;;  %s1128_s30 = scalar_lea.hbm %s1561_s3, 4096 }
  0x25   :  { %s43_s26 = sshll.u32 %s1204_s25, 4  ;;  %p1129_p2 = scmp.ne.s32.totalorder %s1561_s3, %s1128_s30  ;;  %s44_s26 = int_to_ptr.vmem [resolvable:$true] %s43_s26 }
  0x26   :  { %p1132_p3 = scmp.lt.u32.totalorder %s1128_s30, %s1561_s3 }
  0x28   :  { %p1134_p4 = pnand %p1132_p3, %p1129_p2 }
  0x2a   :  { %1137 = shalt.err (!%p1134_p4)
}
  0x2b   :  { %s1138_s12 = scalar_lea.vmem %s44_s26, 4096  ;;  %p1143_p6 = scmp.lt.s32.totalorder %s44_s26, %s44_s26 }
  0x2c   :  { %p1139_p5 = scmp.ne.s32.totalorder %s44_s26, %s1138_s12  ;;  %p1144_p7 = scmp.lt.s32.totalorder %s1138_s12, %s1138_s12 }
  0x2e   :  { %p1145_p8 = por %p1144_p7, %p1143_p6 }
  0x30   :  { %p1146_p9 = pnand %p1145_p8, %p1139_p5 }
  0x32   :  { %1149 = shalt.err (!%p1146_p9)
}
  0x33   :  { %s1205_s0 = smov 256   ;;  %s1206_s27 = smov 16  }
  0x34   :  { %49 = dma.hbm_to_vmem [thread:$0]  %s1561_s3, 4096, %s44_s26, [#allocation6], %s1205_s0, %s1205_s0, %s1206_s27  }
  0x35   :  { %s1207_s15 = smov [#allocation8]   ;;  %s1150_s19 = scalar_lea.hbm %s1563_s5, 1024 }
  0x36   :  { %s57_s16 = sshll.u32 %s1207_s15, 4  ;;  %p1151_p10 = scmp.ne.s32.totalorder %s1563_s5, %s1150_s19  ;;  %s58_s16 = int_to_ptr.vmem [resolvable:$true] %s57_s16 }
  0x37   :  { %p1154_p11 = scmp.lt.u32.totalorder %s1150_s19, %s1563_s5 }
  0x39   :  { %p1156_p12 = pnand %p1154_p11, %p1151_p10 }
  0x3b   :  { %1159 = shalt.err (!%p1156_p12)
}
  0x3c   :  { %s1160_s1 = scalar_lea.vmem %s58_s16, 1024  ;;  %p1165_p0 = scmp.lt.s32.totalorder %s58_s16, %s58_s16 }
  0x3d   :  { %p1161_p13 = scmp.ne.s32.totalorder %s58_s16, %s1160_s1  ;;  %p1166_p1 = scmp.lt.s32.totalorder %s1160_s1, %s1160_s1 }
  0x3f   :  { %p1167_p2 = por %p1166_p1, %p1165_p0 }
  0x41   :  { %p1168_p3 = pnand %p1167_p2, %p1161_p13 }
  0x43   :  { %1171 = shalt.err (!%p1168_p3)
}
  0x44   :  { %s1208_s3 = smov 64   ;;  %s1209_s24 = smov 4  }
  0x45   :  { %63 = dma.hbm_to_vmem [thread:$0]  %s1563_s5, 1024, %s58_s16, [#allocation9], %s1208_s3, %s1208_s3, %s1209_s24  }
  0x46   :  { %1194 = dma.done.wait [#allocation3], 16  }
  0x47   :  { %1195 = vsyncadd [#allocation3], 4294967280 }
  0x48   :  { %1196 = dma.done.wait [#allocation6], 4352  }
  0x49   :  { %1197 = vsyncadd [#allocation6], 4294962944 }
  0x4a   :  { %1198 = dma.done.wait [#allocation9], 1024  }
  0x4b   :  { %1199 = vsyncadd [#allocation9], 4294966272  ;;  %v1210_v0 = vmov 0   ;;  %v81_v1 = vld [vmem:[#allocation5] sm:$0xff]  ;;  %vm119_vm0 = vcmask 1043456   ;;  %v82_v3 = vld [vmem:[#allocation5 + $0x8] sm:$0xff]  ;;  %v95_v43 = vlaneseq }
  0x4c   :  { %164 = vmatprep.mubr.bf16.mxu1 %v1210_v0  ;;  %479 = vmatprep.mubr.bf16.mxu0 %v1210_v0  ;;  %v79_v2 = vld [vmem:[#allocation2] sm:$0x1]  ;;  %v895_v4 = vcombine.high %v81_v1, %v81_v1  ;;  %v894_v5 = vcombine.low %v81_v1, %v81_v1  ;;  %v897_v6 = vcombine.high %v82_v3, %v82_v3  ;;  %vm115_vm1 = vcmask 64512   ;;  %v1306_v11 = vld [vmem:[#allocation7 + $0x4] ss:$16 sps:$4 sm:$0xff]   ;;  %s1213_s8 = smov [#allocation10]  }
  0x4d   :  { %v896_v7 = vcombine.low %v82_v3, %v82_v3  ;;  %v80_v9 = vpack.c.bf16 %v79_v2, %v79_v2  ;;  %v1308_v12 = vld [vmem:[#allocation7 + $0xc] ss:$16 sps:$4 sm:$0xff]   ;;  %v1310_v13 = vld [vmem:[#allocation7 + $0x8] ss:$16 sps:$4 sm:$0xff]   ;;  %v1312_v14 = vld [vmem:[#allocation7] ss:$16 sps:$4 sm:$0xff]   ;;  %447 = vmatprep.subr.bf16.mxu0 %v1306_v11 }
  0x4e   :  { %898 = vmatprep.subr.msk.bf16.mxu1 %vm119_vm0, %v895_v4  ;;  %v121_v8 = vsel %vm119_vm0, %v894_v5, 0  ;;  %448 = vmatpush1.bf16.msra.mxu0 %v1312_v14  ;;  %v1318_v15 = vld [vmem:[#allocation7 + $0x24] ss:$16 sps:$4 sm:$0xff]   ;;  %v1320_v16 = vld [vmem:[#allocation7 + $0x2c] ss:$16 sps:$4 sm:$0xff]   ;;  %v1404_v44 = vshrl.u32 %v95_v43, 7 }
  0x4f   :  { %133 = vmatpush1.bf16.msra.mxu1 %v121_v8  ;;  %v127_v10 = vsel %vm119_vm0, %v896_v7, 0  ;;  %v1322_v17 = vld [vmem:[#allocation7 + $0x28] ss:$16 sps:$4 sm:$0xff]   ;;  %v1324_v18 = vld [vmem:[#allocation7 + $0x20] ss:$16 sps:$4 sm:$0xff]   ;;  %449 = vmatprep.subr.bf16.mxu0 %v1318_v15  ;;  %vm758_vm2 = vcmask 1040384  }
  0x50   :  { %900 = vmatprep.subr.msk.bf16.mxu1 %vm119_vm0, %v897_v6  ;;  %v1330_v19 = vld [vmem:[#allocation7 + $0x44] ss:$16 sps:$4 sm:$0xff]   ;;  %v1332_v20 = vld [vmem:[#allocation7 + $0x4c] ss:$16 sps:$4 sm:$0xff]   ;;  %v1334_v21 = vld [vmem:[#allocation7 + $0x48] ss:$16 sps:$4 sm:$0xff]  }
  0x51   :  { %v1336_v22 = vld [vmem:[#allocation7 + $0x40] ss:$16 sps:$4 sm:$0xff]   ;;  %v1342_v23 = vld [vmem:[#allocation7 + $0x64] ss:$16 sps:$4 sm:$0xff]   ;;  %v1344_v24 = vld [vmem:[#allocation7 + $0x6c] ss:$16 sps:$4 sm:$0xff]  }
  0x52   :  { %899 = vmatmul.mubr.msk.bf16.vlgmr.msra.gmra.mrb[0].mxu1 %vm115_vm1, %v80_v9  ;;  %450 = vmatpush1.bf16.msra.mxu0 %v1324_v18  ;;  %v1346_v25 = vld [vmem:[#allocation7 + $0x68] ss:$16 sps:$4 sm:$0xff]   ;;  %v1348_v26 = vld [vmem:[#allocation7 + $0x60] ss:$16 sps:$4 sm:$0xff]   ;;  %v1354_v27 = vld [vmem:[#allocation7 + $0x84] ss:$16 sps:$4 sm:$0xff]  }
  0x53   :  { %174 = vmatpush1.bf16.msra.mxu1 %v127_v10  ;;  %205 = vmatprep.mubr.bf16.mxu1 %v1210_v0  ;;  %v1356_v28 = vld [vmem:[#allocation7 + $0x8c] ss:$16 sps:$4 sm:$0xff]   ;;  %v1358_v29 = vld [vmem:[#allocation7 + $0x88] ss:$16 sps:$4 sm:$0xff]   ;;  %v1360_v30 = vld [vmem:[#allocation7 + $0x80] ss:$16 sps:$4 sm:$0xff]  }
  0x54   :  { %488 = vmatprep.subr.bf16.mxu1 %v1308_v12  ;;  %451 = vmatprep.subr.bf16.mxu0 %v1330_v19  ;;  %v1366_v31 = vld [vmem:[#allocation7 + $0xa4] ss:$16 sps:$4 sm:$0xff]   ;;  %v1368_v32 = vld [vmem:[#allocation7 + $0xa8] ss:$16 sps:$4 sm:$0xff]   ;;  %v1370_v33 = vld [vmem:[#allocation7 + $0xac] ss:$16 sps:$4 sm:$0xff]  }
  0x55   :  { %v1372_v34 = vld [vmem:[#allocation7 + $0xa0] ss:$16 sps:$4 sm:$0xff]   ;;  %v1374_v35 = vld [vmem:[#allocation7 + $0xc4] ss:$16 sps:$4 sm:$0xff]   ;;  %v1378_v36 = vld [vmem:[#allocation7 + $0xcc] ss:$16 sps:$4 sm:$0xff]  }
  0x56   :  { %452 = vmatpush1.bf16.msra.mxu0 %v1336_v22  ;;  %v1382_v37 = vld [vmem:[#allocation7 + $0xc8] ss:$16 sps:$4 sm:$0xff]   ;;  %v1384_v38 = vld [vmem:[#allocation7 + $0xc0] ss:$16 sps:$4 sm:$0xff]   ;;  %v1388_v39 = vld [vmem:[#allocation7 + $0xe4] ss:$16 sps:$4 sm:$0xff]  }
  0x57   :  { %453 = vmatprep.subr.bf16.mxu0 %v1342_v23  ;;  %v1390_v40 = vld [vmem:[#allocation7 + $0xec] ss:$16 sps:$4 sm:$0xff]   ;;  %v1394_v41 = vld [vmem:[#allocation7 + $0xe8] ss:$16 sps:$4 sm:$0xff]   ;;  %v1396_v42 = vld [vmem:[#allocation7 + $0xe0] ss:$16 sps:$4 sm:$0xff]  }
  0x58   :  { %v97_v45 = vsub.s32 0, %v1404_v44  ;;  %v83_v46 = vld [vmem:[%s1560_s2] sm:$0xf]  ;;  %v101_v47 = vsub.s32 1, %v1404_v44  ;;  %v105_v53 = vsub.s32 2, %v1404_v44  ;;  %v109_v56 = vsub.s32 3, %v1404_v44 }
  0x59   :  { %vm760_vm3 = vcmask 1041408   ;;  %vm1212_vm4 = vmmov 0   ;;  %vm762_vm5 = vcmask 1042432   ;;  %s883_s9 = sshll.u32 %s1213_s8, 4  ;;  %s884_s9 = int_to_ptr.vmem [resolvable:$true] %s883_s9 }
  0x5a   :  { %901 = vmatmul.mubr.msk.bf16.vlgmr.msra.gmra.mrb[4].mxu1 %vm115_vm1, %v80_v9  ;;  %454 = vmatpush1.bf16.msra.mxu0 %v1348_v26  ;;  %v98_v48 = vrot.slane %v83_v46, %v97_v45  ;;  %v102_v49 = vrot.slane %v83_v46, %v101_v47  ;;  %v106_v60 = vrot.slane %v83_v46, %v105_v53  ;;  %s1172_s10 = scalar_lea.vmem %s884_s9, 64  ;;  %p1177_p5 = scmp.lt.s32.totalorder %s884_s9, %s884_s9 }
  0x5b   :  { %520 = vmatprep.mubr.bf16.mxu1 %v1210_v0  ;;  %489 = vmatpush1.bf16.msra.mxu1 %v1310_v13  ;;  %v110_v61 = vrot.slane %v83_v46, %v109_v56  ;;  %p1173_p4 = scmp.ne.s32.totalorder %s884_s9, %s1172_s10  ;;  %p1178_p6 = scmp.lt.s32.totalorder %s1172_s10, %s1172_s10 }
  0x5c   :  { %490 = vmatprep.subr.bf16.mxu1 %v1320_v16  ;;  %455 = vmatprep.subr.bf16.mxu0 %v1354_v27 }
  0x5d   :  { %p1179_p7 = por %p1178_p6, %p1177_p5 }
  0x5e   :  { %456 = vmatpush1.bf16.msra.mxu0 %v1360_v30 }
  0x5f   :  { %491 = vmatpush1.bf16.msra.mxu1 %v1322_v17  ;;  %457 = vmatprep.subr.bf16.mxu0 %v1366_v31  ;;  %p1180_p8 = pnand %p1179_p7, %p1173_p4 }
  0x60   :  { %492 = vmatprep.subr.bf16.mxu1 %v1332_v20 }
  0x62   :  { %458 = vmatpush1.bf16.msra.mxu0 %v1372_v34 }
  0x63   :  { %493 = vmatpush1.bf16.msra.mxu1 %v1334_v21  ;;  %459 = vmatprep.subr.bf16.mxu0 %v1374_v35 }
  0x64   :  { %494 = vmatprep.subr.bf16.mxu1 %v1344_v24 }
  0x66   :  { %460 = vmatpush1.bf16.msra.mxu0 %v1384_v38 }
  0x67   :  { %495 = vmatpush1.bf16.msra.mxu1 %v1346_v25  ;;  %461 = vmatprep.subr.bf16.mxu0 %v1388_v39 }
  0x68   :  { %496 = vmatprep.subr.bf16.mxu1 %v1356_v28 }
  0x6a   :  { %462 = vmatpush1.bf16.msra.mxu0 %v1396_v42 }
  0x6b   :  { %497 = vmatpush1.bf16.msra.mxu1 %v1358_v29  ;;  %548 = vmatprep.subr.bf16.mxu0 %v1306_v11 }
  0x6c   :  { %498 = vmatprep.subr.bf16.mxu1 %v1370_v33 }
  0x6f   :  { %499 = vmatpush1.bf16.msra.mxu1 %v1368_v32 }
  0x70   :  { %500 = vmatprep.subr.bf16.mxu1 %v1378_v36 }
  0x73   :  { %501 = vmatpush1.bf16.msra.mxu1 %v1382_v37 }
  0x74   :  { %502 = vmatprep.subr.bf16.mxu1 %v1390_v40 }
  0x77   :  { %503 = vmatpush1.bf16.msra.mxu1 %v1394_v41 }
  0x78   :  { %589 = vmatprep.subr.bf16.mxu1 %v1308_v12 }
 0x125   :  { %v166_v50 = vpop.f32.mrb[0].mxu1 }
 0x126   :  { %v167_v51 = vadd.f32 %v166_v50, %v98_v48  ;;  %v168_v52 = vpop.f32.mrb[1].mxu1 }
 0x127   :  { %v169_v54 = vadd.f32 %v168_v52, %v102_v49  ;;  %v170_v55 = vpop.f32.mrb[2].mxu1 }
 0x128   :  { %v214_v57 = vmul.f32 0.5, %v167_v51  ;;  %v171_v58 = vpop.f32.mrb[3].mxu1 }
 0x129   :  { %v218_v59 = vmul.f32 0.5, %v169_v54 }
 0x12a   :  { %1044 = vtanh.f32 %v214_v57 }
 0x12b   :  { %1046 = vtanh.f32 %v218_v59  ;;  %v265_v59 = vld [vmem:[%s1562_s4] sm:$0xf] }
 0x12d   :  { %v207_v62 = vpop.f32.mrb[4].mxu1 }
 0x12e   :  { %v208_v63 = vadd.f32 %v207_v62, %v106_v60  ;;  %v209_v1 = vpop.f32.mrb[5].mxu1  ;;  %v1467_v60 = vrot.slane %v265_v59, %v97_v45 }
 0x12f   :  { %v210_v2 = vadd.f32 %v209_v1, %v110_v61  ;;  %v211_v3 = vpop.f32.mrb[6].mxu1  ;;  %v1471_v61 = vrot.slane %v265_v59, %v101_v47 }
 0x130   :  { %1048 = vtanh.f32 %v208_v63  ;;  %v212_v4 = vpop.f32.mrb[7].mxu1 }
 0x131   :  { %v223_v5 = vmul.f32 0.5, %v210_v2 }
 0x133   :  { %1050 = vtanh.f32 %v223_v5 }
 0x134   :  { %v1045_v6 = vpop.eup %1044 }
 0x135   :  { %v1047_v7 = vpop.eup %1046  ;;  %v216_v8 = vmul.f32 0.5, %v1045_v6 }
 0x136   :  { %v220_v9 = vmul.f32 0.5, %v1047_v7 }
 0x137   :  { %v217_v43 = vadd.f32 0.5, %v216_v8 }
 0x138   :  { %v221_v10 = vadd.f32 0.5, %v220_v9  ;;  %v1482_v9 = vrot.slane %v265_v59, %v109_v56 }
 0x13a   :  { %v1049_v48 = vpop.eup %1048  ;;  %v227_v49 = vmul.f32 0.0, %v221_v10 }
 0x13b   :  { %v228_v50 = vmul.f32 %v1049_v48, %v217_v43 }
 0x13d   :  { %v1421_v51 = vadd.f32 %v228_v50, %v227_v49  ;;  %v1051_v46 = vpop.eup %1050 }
 0x13e   :  { %v225_v52 = vmul.f32 0.5, %v1051_v46 }
 0x13f   :  { %1052 = vtanh.f32 %v1421_v51 }
 0x140   :  { %v226_v54 = vadd.f32 0.5, %v225_v52 }
 0x149   :  { %v1053_v55 = vpop.eup %1052 }
 0x14a   :  { %v1424_v57 = vmul.f32 %v1053_v55, %v226_v54 }
 0x14c   :  { %v232_v58 = vpack.c.bf16 %v1424_v57, %v1424_v57 }
 0x14e   :  { %480 = vmatmul.mubr.bf16.vlgmr.msra.gmra.mrb[0].mxu0 %v232_v58  ;;  %521 = vmatmul.mubr.bf16.vlgmr.msra.gmra.mrb[8].mxu1 %v232_v58 }
 0x14f   :  { %549 = vmatpush1.bf16.msra.mxu0 %v1312_v14  ;;  %590 = vmatpush1.bf16.msra.mxu1 %v1310_v13 }
 0x150   :  { %550 = vmatprep.subr.bf16.mxu0 %v1318_v15  ;;  %591 = vmatprep.subr.bf16.mxu1 %v1320_v16 }
 0x151   :  { %580 = vmatprep.mubr.bf16.mxu0 %v1210_v0  ;;  %621 = vmatprep.mubr.bf16.mxu1 %v1210_v0 }
 0x153   :  { %551 = vmatpush1.bf16.msra.mxu0 %v1324_v18  ;;  %592 = vmatpush1.bf16.msra.mxu1 %v1322_v17 }
 0x154   :  { %552 = vmatprep.subr.bf16.mxu0 %v1330_v19  ;;  %593 = vmatprep.subr.bf16.mxu1 %v1332_v20 }
 0x157   :  { %553 = vmatpush1.bf16.msra.mxu0 %v1336_v22  ;;  %594 = vmatpush1.bf16.msra.mxu1 %v1334_v21 }
 0x158   :  { %554 = vmatprep.subr.bf16.mxu0 %v1342_v23  ;;  %595 = vmatprep.subr.bf16.mxu1 %v1344_v24 }
 0x15b   :  { %555 = vmatpush1.bf16.msra.mxu0 %v1348_v26  ;;  %596 = vmatpush1.bf16.msra.mxu1 %v1346_v25 }
 0x15c   :  { %556 = vmatprep.subr.bf16.mxu0 %v1354_v27  ;;  %597 = vmatprep.subr.bf16.mxu1 %v1356_v28 }
 0x15f   :  { %557 = vmatpush1.bf16.msra.mxu0 %v1360_v30  ;;  %598 = vmatpush1.bf16.msra.mxu1 %v1358_v29 }
 0x160   :  { %558 = vmatprep.subr.bf16.mxu0 %v1366_v31  ;;  %599 = vmatprep.subr.bf16.mxu1 %v1370_v33 }
 0x163   :  { %559 = vmatpush1.bf16.msra.mxu0 %v1372_v34  ;;  %600 = vmatpush1.bf16.msra.mxu1 %v1368_v32 }
 0x164   :  { %560 = vmatprep.subr.bf16.mxu0 %v1374_v35  ;;  %601 = vmatprep.subr.bf16.mxu1 %v1378_v36 }
 0x167   :  { %561 = vmatpush1.bf16.msra.mxu0 %v1384_v38  ;;  %602 = vmatpush1.bf16.msra.mxu1 %v1382_v37 }
 0x168   :  { %562 = vmatprep.subr.bf16.mxu0 %v1388_v39  ;;  %603 = vmatprep.subr.bf16.mxu1 %v1390_v40 }
 0x16b   :  { %563 = vmatpush1.bf16.msra.mxu0 %v1396_v42  ;;  %604 = vmatpush1.bf16.msra.mxu1 %v1394_v41 }
 0x16c   :  { %649 = vmatprep.subr.bf16.mxu0 %v1306_v11  ;;  %690 = vmatprep.subr.bf16.mxu1 %v1308_v12  ;;  %v1476_v11 = vrot.slane %v265_v59, %v105_v53 }
 0x221   :  { %v481_v62 = vpop.f32.mrb[0].mxu0  ;;  %v522_v63 = vpop.f32.mrb[8].mxu1 }
 0x222   :  { %v482_v1 = vadd.f32 %v481_v62, %v1467_v60  ;;  %v483_v12 = vpop.f32.mrb[1].mxu0  ;;  %v524_v2 = vpop.f32.mrb[9].mxu1  ;;  %v523_v47 = vadd.f32 %v522_v63, %v1476_v11 }
 0x223   :  { %v484_v3 = vadd.f32 %v483_v12, %v1471_v61  ;;  %v485_v4 = vpop.f32.mrb[2].mxu0  ;;  %v526_v5 = vpop.f32.mrb[10].mxu1  ;;  %v525_v53 = vadd.f32 %v524_v2, %v1482_v9 }
 0x224   :  { %v529_v45 = vmul.f32 0.5, %v482_v1  ;;  %v486_v6 = vpop.f32.mrb[3].mxu0  ;;  %v527_v7 = vpop.f32.mrb[11].mxu1  ;;  %v1036_v5 = vld [vmem:[#allocation8] sm:$0xff]  }
 0x225   :  { %v533_v8 = vmul.f32 0.5, %v484_v3  ;;  %v538_v10 = vmul.f32 0.5, %v525_v53  ;;  %v1037_v6 = vld [vmem:[#allocation8 + $0x8] sm:$0xff]   ;;  %v1038_v7 = vld [vmem:[#allocation8 + $0x10] sm:$0xff]  }
 0x226   :  { %1054 = vtanh.f32 %v529_v45  ;;  %v1211_v45 = vmov 0.0   ;;  %v1042_v53 = vld [vmem:[#allocation8 + $0x30] sm:$0xff]  }
 0x227   :  { %1056 = vtanh.f32 %v533_v8  ;;  %v1039_v8 = vld [vmem:[#allocation8 + $0x18] sm:$0xff]  }
 0x228   :  { %1058 = vtanh.f32 %v523_v47  ;;  %v1040_v47 = vld [vmem:[#allocation8 + $0x20] sm:$0xff]  }
 0x229   :  { %1060 = vtanh.f32 %v538_v10  ;;  %v1043_v10 = vld [vmem:[#allocation8 + $0x38] sm:$0xff]  }
 0x230   :  { %v1055_v43 = vpop.eup %1054 }
 0x231   :  { %v1057_v48 = vpop.eup %1056  ;;  %v531_v49 = vmul.f32 0.5, %v1055_v43 }
 0x232   :  { %v535_v50 = vmul.f32 0.5, %v1057_v48  ;;  %v1059_v52 = vpop.eup %1058 }
 0x233   :  { %v532_v46 = vadd.f32 0.5, %v531_v49  ;;  %v1061_v44 = vpop.eup %1060 }
 0x234   :  { %v536_v54 = vadd.f32 0.5, %v535_v50  ;;  %v540_v56 = vmul.f32 0.5, %v1061_v44 }
 0x235   :  { %v543_v55 = vmul.f32 %v1059_v52, %v532_v46 }
 0x236   :  { %v542_v58 = vmul.f32 %v536_v54, %v1421_v51  ;;  %v541_v59 = vadd.f32 0.5, %v540_v56 }
 0x238   :  { %v1486_v62 = vadd.f32 %v543_v55, %v542_v58 }
 0x23a   :  { %1062 = vtanh.f32 %v1486_v62 }
 0x244   :  { %v1063_v63 = vpop.eup %1062 }
 0x245   :  { %v1489_v1 = vmul.f32 %v1063_v63, %v541_v59 }
 0x247   :  { %v547_v12 = vpack.c.bf16 %v1489_v1, %v1489_v1 }
 0x249   :  { %581 = vmatmul.mubr.bf16.vlgmr.msra.gmra.mrb[4].mxu0 %v547_v12  ;;  %622 = vmatmul.mubr.bf16.vlgmr.msra.gmra.mrb[12].mxu1 %v547_v12 }
 0x24a   :  { %650 = vmatpush1.bf16.msra.mxu0 %v1312_v14  ;;  %691 = vmatpush1.bf16.msra.mxu1 %v1310_v13 }
 0x24b   :  { %651 = vmatprep.subr.bf16.mxu0 %v1318_v15  ;;  %692 = vmatprep.subr.bf16.mxu1 %v1320_v16 }
 0x24c   :  { %681 = vmatprep.mubr.bf16.mxu0 %v1210_v0  ;;  %722 = vmatprep.mubr.bf16.mxu1 %v1210_v0 }
 0x24e   :  { %652 = vmatpush1.bf16.msra.mxu0 %v1324_v18  ;;  %693 = vmatpush1.bf16.msra.mxu1 %v1322_v17 }
 0x24f   :  { %653 = vmatprep.subr.bf16.mxu0 %v1330_v19  ;;  %694 = vmatprep.subr.bf16.mxu1 %v1332_v20 }
 0x252   :  { %654 = vmatpush1.bf16.msra.mxu0 %v1336_v22  ;;  %695 = vmatpush1.bf16.msra.mxu1 %v1334_v21 }
 0x253   :  { %655 = vmatprep.subr.bf16.mxu0 %v1342_v23  ;;  %696 = vmatprep.subr.bf16.mxu1 %v1344_v24 }
 0x256   :  { %656 = vmatpush1.bf16.msra.mxu0 %v1348_v26  ;;  %697 = vmatpush1.bf16.msra.mxu1 %v1346_v25 }
 0x257   :  { %657 = vmatprep.subr.bf16.mxu0 %v1354_v27  ;;  %698 = vmatprep.subr.bf16.mxu1 %v1356_v28 }
 0x25a   :  { %658 = vmatpush1.bf16.msra.mxu0 %v1360_v30  ;;  %699 = vmatpush1.bf16.msra.mxu1 %v1358_v29 }
 0x25b   :  { %659 = vmatprep.subr.bf16.mxu0 %v1366_v31  ;;  %700 = vmatprep.subr.bf16.mxu1 %v1370_v33 }
 0x25e   :  { %660 = vmatpush1.bf16.msra.mxu0 %v1372_v34  ;;  %701 = vmatpush1.bf16.msra.mxu1 %v1368_v32 }
 0x25f   :  { %661 = vmatprep.subr.bf16.mxu0 %v1374_v35  ;;  %702 = vmatprep.subr.bf16.mxu1 %v1378_v36 }
 0x262   :  { %662 = vmatpush1.bf16.msra.mxu0 %v1384_v38  ;;  %703 = vmatpush1.bf16.msra.mxu1 %v1382_v37 }
 0x263   :  { %663 = vmatprep.subr.bf16.mxu0 %v1388_v39  ;;  %704 = vmatprep.subr.bf16.mxu1 %v1390_v40 }
 0x266   :  { %664 = vmatpush1.bf16.msra.mxu0 %v1396_v42  ;;  %705 = vmatpush1.bf16.msra.mxu1 %v1394_v41  ;;  %v750_v41 = vrot.slane %v1489_v1, 7 }
 0x267   :  { %952 = vmatprep.subr.bf16.mxu0 %v1211_v45 }
 0x268   :  { %v759_v3 = vsel %vm758_vm2, %v1424_v57, %v750_v41  ;;  %v1041_v57 = vld [vmem:[#allocation8 + $0x28] sm:$0xff]  }
 0x31c   :  { %v582_v0 = vpop.f32.mrb[4].mxu0  ;;  %v623_v13 = vpop.f32.mrb[12].mxu1 }
 0x31d   :  { %v583_v14 = vadd.f32 %v582_v0, %v1467_v60  ;;  %v584_v15 = vpop.f32.mrb[5].mxu0  ;;  %v625_v16 = vpop.f32.mrb[13].mxu1  ;;  %v624_v24 = vadd.f32 %v623_v13, %v1476_v11 }
 0x31e   :  { %v585_v17 = vadd.f32 %v584_v15, %v1471_v61  ;;  %v586_v18 = vpop.f32.mrb[6].mxu0  ;;  %v627_v19 = vpop.f32.mrb[14].mxu1  ;;  %v626_v25 = vadd.f32 %v625_v16, %v1482_v9 }
 0x31f   :  { %v630_v20 = vmul.f32 0.5, %v583_v14  ;;  %v587_v21 = vpop.f32.mrb[7].mxu0  ;;  %v628_v22 = vpop.f32.mrb[15].mxu1 }
 0x320   :  { %v634_v23 = vmul.f32 0.5, %v585_v17  ;;  %v639_v26 = vmul.f32 0.5, %v626_v25  ;;  %v934_v25 = vld [vmem:[%s1564_s6] ss:$0 sm:$0xff] }
 0x321   :  { %1064 = vtanh.f32 %v630_v20 }
 0x322   :  { %1066 = vtanh.f32 %v634_v23 }
 0x323   :  { %1068 = vtanh.f32 %v624_v24 }
 0x324   :  { %1070 = vtanh.f32 %v639_v26 }
 0x32b   :  { %v1065_v27 = vpop.eup %1064 }
 0x32c   :  { %v1067_v28 = vpop.eup %1066  ;;  %v632_v29 = vmul.f32 0.5, %v1065_v27 }
 0x32d   :  { %v636_v30 = vmul.f32 0.5, %v1067_v28  ;;  %v1069_v32 = vpop.eup %1068 }
 0x32e   :  { %v633_v31 = vadd.f32 0.5, %v632_v29  ;;  %v1071_v37 = vpop.eup %1070 }
 0x32f   :  { %v637_v33 = vadd.f32 0.5, %v636_v30  ;;  %v641_v38 = vmul.f32 0.5, %v1071_v37 }
 0x330   :  { %v644_v34 = vmul.f32 %v1069_v32, %v633_v31 }
 0x331   :  { %v643_v35 = vmul.f32 %v637_v33, %v1486_v62  ;;  %v642_v39 = vadd.f32 0.5, %v641_v38 }
 0x333   :  { %v1530_v36 = vadd.f32 %v644_v34, %v643_v35 }
 0x335   :  { %1072 = vtanh.f32 %v1530_v36 }
 0x33f   :  { %v1073_v40 = vpop.eup %1072 }
 0x340   :  { %v647_v42 = vmul.f32 %v1073_v40, %v642_v39 }
 0x342   :  { %v753_v51 = vrot.slane %v647_v42, 6  ;;  %v648_v2 = vpack.c.bf16 %v647_v42, %v647_v42 }
 0x344   :  { %682 = vmatmul.mubr.bf16.vlgmr.msra.gmra.mrb[8].mxu0 %v648_v2  ;;  %723 = vmatmul.mubr.bf16.vlgmr.msra.gmra.mrb[16].mxu1 %v648_v2  ;;  %v1535_v4 = vsel %vm760_vm3, %v759_v3, %v753_v51 }
 0x345   :  { %953 = vmatpush3.bf16.msra.mxu0 %v1036_v5  ;;  %968 = vmatprep.mubr.msk.bf16.mxu0 %vm1212_vm4, %v1211_v45 }
 0x346   :  { %954 = vmatprep.subr.bf16.mxu0 %v1211_v45 }
 0x349   :  { %955 = vmatpush3.bf16.msra.mxu0 %v1037_v6 }
 0x34a   :  { %956 = vmatprep.subr.bf16.mxu0 %v1211_v45 }
 0x34d   :  { %957 = vmatpush3.bf16.msra.mxu0 %v1038_v7 }
 0x34e   :  { %958 = vmatprep.subr.bf16.mxu0 %v1211_v45 }
 0x351   :  { %959 = vmatpush3.bf16.msra.mxu0 %v1039_v8 }
 0x352   :  { %960 = vmatprep.subr.bf16.mxu0 %v1211_v45 }
 0x355   :  { %961 = vmatpush3.bf16.msra.mxu0 %v1040_v47 }
 0x356   :  { %962 = vmatprep.subr.bf16.mxu0 %v1211_v45 }
 0x359   :  { %963 = vmatpush3.bf16.msra.mxu0 %v1041_v57 }
 0x35a   :  { %964 = vmatprep.subr.bf16.mxu0 %v1211_v45 }
 0x35d   :  { %965 = vmatpush3.bf16.msra.mxu0 %v1042_v53 }
 0x35e   :  { %966 = vmatprep.subr.bf16.mxu0 %v1211_v45 }
 0x361   :  { %967 = vmatpush3.bf16.msra.mxu0 %v1043_v10 }
 0x417   :  { %v683_v43 = vpop.f32.mrb[8].mxu0  ;;  %v724_v48 = vpop.f32.mrb[16].mxu1 }
 0x418   :  { %v684_v49 = vadd.f32 %v683_v43, %v1467_v60  ;;  %v685_v50 = vpop.f32.mrb[9].mxu0  ;;  %v726_v46 = vpop.f32.mrb[17].mxu1  ;;  %v725_v59 = vadd.f32 %v724_v48, %v1476_v11 }
 0x419   :  { %v686_v52 = vadd.f32 %v685_v50, %v1471_v61  ;;  %v687_v54 = vpop.f32.mrb[10].mxu0  ;;  %v728_v55 = vpop.f32.mrb[18].mxu1  ;;  %v727_v63 = vadd.f32 %v726_v46, %v1482_v9 }
 0x41a   :  { %v731_v58 = vmul.f32 0.5, %v684_v49  ;;  %v688_v62 = vpop.f32.mrb[11].mxu0  ;;  %v729_v44 = vpop.f32.mrb[19].mxu1 }
 0x41b   :  { %v735_v56 = vmul.f32 0.5, %v686_v52  ;;  %v740_v1 = vmul.f32 0.5, %v727_v63 }
 0x41c   :  { %1074 = vtanh.f32 %v731_v58 }
 0x41d   :  { %1076 = vtanh.f32 %v735_v56 }
 0x41e   :  { %1078 = vtanh.f32 %v725_v59 }
 0x41f   :  { %1080 = vtanh.f32 %v740_v1 }
 0x426   :  { %v1075_v12 = vpop.eup %1074 }
 0x427   :  { %v1077_v60 = vpop.eup %1076  ;;  %v733_v0 = vmul.f32 0.5, %v1075_v12 }
 0x428   :  { %v737_v13 = vmul.f32 0.5, %v1077_v60  ;;  %v1079_v14 = vpop.eup %1078 }
 0x429   :  { %v734_v61 = vadd.f32 0.5, %v733_v0  ;;  %v1081_v19 = vpop.eup %1080 }
 0x42a   :  { %v738_v15 = vadd.f32 0.5, %v737_v13  ;;  %v742_v11 = vmul.f32 0.5, %v1081_v19 }
 0x42b   :  { %v745_v16 = vmul.f32 %v1079_v14, %v734_v61 }
 0x42c   :  { %v744_v17 = vmul.f32 %v738_v15, %v1530_v36  ;;  %v743_v20 = vadd.f32 0.5, %v742_v11 }
 0x42e   :  { %v746_v18 = vadd.f32 %v745_v16, %v744_v17 }
 0x430   :  { %1082 = vtanh.f32 %v746_v18 }
 0x43a   :  { %v1083_v21 = vpop.eup %1082 }
 0x43b   :  { %v748_v22 = vmul.f32 %v1083_v21, %v743_v20 }
 0x43d   :  { %v756_v9 = vrot.slane %v748_v22, 5 }
 0x43f   :  { %v763_v23 = vsel %vm762_vm5, %v1535_v4, %v756_v9 }
 0x440   :  { %v764_v24 = vpack.c.bf16 %v763_v23, %v763_v23 }
 0x442   :  { %969 = vmatmul.mubr.bf16.vlgmr.msra.gmra.mrb[12].mxu0 %v764_v24 }
 0x515   :  { %v870_v26 = vpop.f32.mrb[12].mxu0 }
 0x516   :  { %v871_v27 = vadd.f32 %v934_v25, %v870_v26  ;;  %v970_v28 = vpop.f32.mrb[13].mxu0 }
 0x517   :  { %v873_v29 = vpop.f32.mrb[14].mxu0 }
 0x518   :  { %876 = vst [vmem:[#allocation10] sm:$0xf] %v871_v27  ;;  %v971_v30 = vpop.f32.mrb[15].mxu0 }
 0x519   :  { %1183 = shalt.err (!%p1180_p8)
}
 0x51a   :  { %s1184_s6 = scalar_lea.hbm %s1565_s7, 64 }
 0x51b   :  { %p1185_p9 = scmp.ne.s32.totalorder %s1565_s7, %s1184_s6  ;;  %p1188_p10 = scmp.lt.u32.totalorder %s1184_s6, %s1565_s7 }
 0x51d   :  { %p1190_p11 = pnand %p1188_p10, %p1185_p9 }
 0x51f   :  { %1193 = shalt.err (!%p1190_p11)
}
 0x520   :  { %886 = dma.vmem_to_hbm [thread:$0]  %s884_s9, 64, %s1565_s7, [#allocation4]  }
 0x521   :  { %1200 = dma.done.wait [#allocation4], 64  }
 0x522   :  { %1201 = vsyncadd [#allocation4], 4294967232 }
 0x523   :  { %890 = vsyncpa [#allocation3], 1 }
 0x524   :  { %891 = vsyncpa [#allocation6], 1 }
 0x525   :  { %892 = vsyncpa [#allocation9], 1 }
 0x526   :  { %893 = vsyncpa [#allocation4], 1 }

</bundles_post_ra>
